<compile_context>
chip_gen: v7x
topology: tpu7x:2x2x1
jax: 0.10.0
libtpu: 0.0.40
codegen_flags: <defaults>
</compile_context>

<pallas_src>
import functools
import math

import jax
import jax.numpy as jnp
from jax import lax
from jax.experimental import pallas as pl
from jax.experimental.pallas import tpu as pltpu

LN_EPS = 1e-5          # nn.LayerNorm default (Normalization's eps is not forwarded)
_INV_SQRT2 = 1.0 / math.sqrt(2.0)


def _round_up(x, m):
    return (x + m - 1) // m * m


def _cdiv(a, b):
    return (a + b - 1) // b


def _default_vmem_budget():
    """~62% of physical per-core VMEM: ~40 MiB on v7x, ~80 MiB on v5e/v6e."""
    try:
        cap = int(pltpu.get_tpu_info().vmem_capacity_bytes)
    except Exception:
        cap = 64 * 1024 * 1024
    return min(100 * 1024 * 1024, max(16 * 1024 * 1024, (cap * 5) // 8))


def _mlp_kernel(x_ref, w1_ref, b1_ref, w2_ref, lnp_ref, o_ref, *, d_out, approx_gelu):
    """One row-tile: fc1 -> GELU -> fc2 -> LayerNorm(output_dim).

    H and D_out are zero-padded to 128-lane multiples in the weights; `d_out`
    is the true output width used for the LayerNorm statistics.  Padded lanes
    of y are exactly zero (zero-padded W2 columns / b2 entries), so the mean
    over all lanes equals the mean over true lanes; only the variance needs
    explicit masking.
    """
    x = x_ref[...]            # [tm, D_in]    (MXU operand dtype, D_in unpadded)
    w1 = w1_ref[...]          # [D_in, H_p]
    w2 = w2_ref[...]          # [H_p, Dout_p]

    # fc1 (MXU, f32 accumulate) + bias in f32
    h = jnp.dot(x, w1, preferred_element_type=jnp.float32)
    h = h + b1_ref[...].astype(jnp.float32)

    if approx_gelu:
        # tanh-form GELU: EUP tanh, much cheaper on v5e's VALU
        h = jax.nn.gelu(h, approximate=True)
    else:
        # exact erf GELU == torch.nn.functional.gelu default
        h = 0.5 * h * (1.0 + lax.erf(h * _INV_SQRT2))

    # fc2 (MXU): cast activation to the weight/MXU dtype, accumulate in f32
    y = jnp.dot(h.astype(w2.dtype), w2, preferred_element_type=jnp.float32)

    lnp = lnp_ref[...].astype(jnp.float32)   # [3, Dout_p]: b2 / gamma / beta
    y = y + lnp[0:1, :]

    inv_d = 1.0 / float(d_out)
    mu = jnp.sum(y, axis=-1, keepdims=True) * inv_d
    if d_out == y.shape[-1]:
        centered = y - mu
    else:
        lane = lax.broadcasted_iota(jnp.int32, y.shape, 1)
        centered = jnp.where(lane < d_out, y - mu, 0.0)
    var = jnp.sum(centered * centered, axis=-1, keepdims=True) * inv_d
    y = centered * lax.rsqrt(var + LN_EPS)
    y = y * lnp[1:2, :] + lnp[2:3, :]        # padded gamma/beta are zero

    o_ref[...] = y.astype(o_ref.dtype)


def mlp_pallas(x, w1, b1, w2, b2, gamma, beta, *, tm=1024,
               mxu_dtype=jnp.bfloat16, approx_gelu=False,
               vmem_budget_bytes=None, single_buffer_weights=True):
    """x: [N, input_dim]; returns [N, output_dim].

    mxu_dtype: dtype for the matmul operands (default bf16 -> full-rate MXU
               and half the weight/activation DMA bytes).  Elementwise math
               (GELU / LayerNorm) always runs in f32.
    """
    N, D_in = x.shape
    H = w1.shape[1]
    D_out = w2.shape[1]
    out_dtype = x.dtype

    op_dtype = jnp.dtype(mxu_dtype) if mxu_dtype is not None else jnp.dtype(x.dtype)
    op_isz = op_dtype.itemsize
    out_isz = jnp.dtype(out_dtype).itemsize

    # ---- lane-dense padding of the *weights* only (H, D_out -> mult. of 128) --
    H_p = _round_up(H, 128)
    Dout_p = _round_up(D_out, 128)

    if vmem_budget_bytes is None:
        vmem_budget_bytes = _default_vmem_budget()

    wbuf = 1 if single_buffer_weights else 2
    weight_bytes = op_isz * (D_in * H_p + H_p * Dout_p) + 4 * (H_p + 3 * Dout_p)

    def vmem_est(t):
        # double-buffered x/out tiles + (single/double) resident weights + live f32
        pipe = 2 * t * D_in * op_isz + 2 * t * Dout_p * out_isz + wbuf * weight_bytes
        live = 4 * (t * H_p + 2 * t * Dout_p)
        return pipe + live

    # ---- cast x once if needed (no row / feature padding of x) ---------------
    x_in = x if x.dtype == op_dtype else x.astype(op_dtype)
    N_rows = N
    if N < 8:
        # tiny-N corner: block rows must not exceed the array -> pad to 8 rows
        N_rows = 8
        x_in = jnp.pad(x_in, ((0, 8 - N), (0, 0)))

    # ---- row-tile selection: big, multiple of 8, >=2 grid steps, fits VMEM ---
    tm = max(8, _round_up(min(int(tm), 2048), 8))
    tm = min(tm, _round_up(N_rows, 8))
    if N_rows > 8:
        # guarantee at least 2 row-tile steps so both v7x TensorCores get work
        tm = min(tm, max(8, _round_up(_cdiv(N_rows, 2), 8)))
    while tm > 8 and vmem_est(tm) > vmem_budget_bytes:
        tm = max(8, _round_up(tm // 2, 8))

    grid_n = _cdiv(N_rows, tm)

    # ---- pad weights once (zeros keep the math exact, see kernel comments) ---
    w1_p = jnp.pad(w1, ((0, 0), (0, H_p - H))).astype(op_dtype)
    b1_p = jnp.pad(b1.reshape(1, H), ((0, 0), (0, H_p - H))).astype(jnp.float32)
    w2_p = jnp.pad(w2, ((0, H_p - H), (0, Dout_p - D_out))).astype(op_dtype)
    lnp = jnp.pad(jnp.stack([b2, gamma, beta], axis=0),
                  ((0, 0), (0, Dout_p - D_out))).astype(jnp.float32)

    cost = pl.CostEstimate(
        flops=2 * N_rows * (D_in * H_p + H_p * Dout_p),
        transcendentals=N_rows * H_p,
        bytes_accessed=op_isz * (N_rows * D_in + D_in * H_p + H_p * Dout_p)
                       + 4 * (H_p + 3 * Dout_p)
                       + out_isz * N_rows * Dout_p,
    )

    kernel = functools.partial(_mlp_kernel, d_out=D_out, approx_gelu=approx_gelu)
    out_shape = jax.ShapeDtypeStruct((N_rows, Dout_p), out_dtype)

    def _wspec(shape, single):
        zero_map = lambda i, _n=len(shape): (0,) * _n
        if single:
            # constant-index blocks: one buffer is enough (never re-DMA'd)
            return pl.BlockSpec(shape, zero_map, pipeline_mode=pl.Buffered(1))
        return pl.BlockSpec(shape, zero_map)

    def build(single):
        return pl.pallas_call(
            kernel,
            out_shape=out_shape,
            grid_spec=pltpu.PrefetchScalarGridSpec(
                num_scalar_prefetch=0,
                grid=(grid_n,),
                in_specs=[
                    pl.BlockSpec((tm, D_in), lambda i: (i, 0)),   # x row-tile (unpadded)
                    _wspec((D_in, H_p), single),                  # W1 (resident)
                    _wspec((1, H_p), single),                     # b1
                    _wspec((H_p, Dout_p), single),                # W2 (resident)
                    _wspec((3, Dout_p), single),                  # [b2; gamma; beta]
                ],
                out_specs=pl.BlockSpec((tm, Dout_p), lambda i: (i, 0)),
            ),
            compiler_params=pltpu.CompilerParams(
                dimension_semantics=("parallel",),
                vmem_limit_bytes=int(vmem_budget_bytes),
            ),
            cost_estimate=cost,
        )

    args = (x_in, w1_p, b1_p, w2_p, lnp)
    if single_buffer_weights:
        try:
            out = build(True)(*args)
        except Exception:
            # this JAX/Mosaic build rejects Buffered(1): fall back to default buffering
            out = build(False)(*args)
    else:
        out = build(False)(*args)

    if N_rows != N or Dout_p != D_out:
        out = out[:N, :D_out]
    return out


def mlp_reference(x, w1, b1, w2, b2, gamma, beta):
    h = x @ w1 + b1
    h = 0.5 * h * (1.0 + lax.erf(h / math.sqrt(2.0)))
    y = h @ w2 + b2
    mu = jnp.mean(y, axis=-1, keepdims=True)
    var = jnp.mean((y - mu) ** 2, axis=-1, keepdims=True)
    return (y - mu) * lax.rsqrt(var + LN_EPS) * gamma + beta


if __name__ == "__main__":
    # Small shapes consistent with the module: batch=2, seq=8, input_dim=32,
    # hidden_dim=64, output_dim=32.  Defaults: activation='gelu',
    # layer_norm_input=False, layer_norm_output=True (LayerNorm on output_dim).
    B, S = 2, 8
    D_IN, HID, D_OUT = 32, 64, 32

    key = jax.random.PRNGKey(0)
    kx, k1, kb1, k2, kb2 = jax.random.split(key, 5)

    x = jax.random.normal(kx, (B, S, D_IN), dtype=jnp.float32)

    # Deterministic param init (PyTorch-style uniform bounds), synthetic weights.
    lim1 = 1.0 / math.sqrt(D_IN)
    lim2 = 1.0 / math.sqrt(HID)
    w1 = jax.random.uniform(k1, (D_IN, HID), minval=-lim1, maxval=lim1, dtype=jnp.float32)
    b1 = jax.random.uniform(kb1, (HID,), minval=-lim1, maxval=lim1, dtype=jnp.float32)
    w2 = jax.random.uniform(k2, (HID, D_OUT), minval=-lim2, maxval=lim2, dtype=jnp.float32)
    b2 = jax.random.uniform(kb2, (D_OUT,), minval=-lim2, maxval=lim2, dtype=jnp.float32)
    gamma = jnp.ones((D_OUT,), dtype=jnp.float32)   # nn.LayerNorm weight init
    beta = jnp.zeros((D_OUT,), dtype=jnp.float32)   # nn.LayerNorm bias init

    # flatten (batch, seq) -> rows; kernel works on [N, D]
    x2d = x.reshape(B * S, D_IN)
    ref = mlp_reference(x2d, w1, b1, w2, b2, gamma, beta)

    # f32-MXU path: faithful to the PyTorch forward within 1e-5
    out_f32 = mlp_pallas(x2d, w1, b1, w2, b2, gamma, beta,
                         mxu_dtype=jnp.float32).reshape(B, S, D_OUT)
    jax.block_until_ready(out_f32)
    assert jnp.allclose(out_f32, ref.reshape(B, S, D_OUT),
                        atol=1e-5, rtol=1e-5), "f32 mismatch vs reference"

    # default path: bf16 MXU operands (GELU / LayerNorm still f32)
    out_bf16 = mlp_pallas(x2d, w1, b1, w2, b2, gamma, beta).reshape(B, S, D_OUT)
    jax.block_until_ready(out_bf16)
    assert jnp.allclose(out_bf16, ref.reshape(B, S, D_OUT),
                        atol=5e-2, rtol=5e-2), "bf16 mismatch vs reference"

    # ragged row count: exercises the cdiv grid + masked last-tile store
    n_r = 13
    out_r = mlp_pallas(x2d[:n_r], w1, b1, w2, b2, gamma, beta, mxu_dtype=jnp.float32)
    jax.block_until_ready(out_r)
    assert jnp.allclose(out_r, ref[:n_r], atol=1e-5, rtol=1e-5), "ragged-N mismatch vs reference"

    print("KERNEL_OK")
</pallas_src>

<mosaic_0001>
module attributes {stable_mosaic.version = 11 : i64} {
  func.func @_mlp_kernel(%arg0: i32, %arg1: memref<8x32xf32, #tpu.memory_space<vmem>>, %arg2: memref<32x128xf32, #tpu.memory_space<vmem>>, %arg3: memref<1x128xf32, #tpu.memory_space<vmem>>, %arg4: memref<128x128xf32, #tpu.memory_space<vmem>>, %arg5: memref<3x128xf32, #tpu.memory_space<vmem>>, %arg6: memref<8x128xf32, #tpu.memory_space<vmem>>) attributes {dimension_semantics = [#tpu.dimension_semantics<parallel>], iteration_bounds = array<i64: 2>, scalar_prefetch = 0 : i64, scratch_operands = 0 : i64, tpu.core_type = #tpu.core_type<tc>, window_params = [{transform_indices = @transform_0, window_bounds = array<i64: 8, 32>}, {pipeline_mode = #tpu.pipeline_mode<synchronous>, transform_indices = @transform_1, window_bounds = array<i64: 32, 128>}, {pipeline_mode = #tpu.pipeline_mode<synchronous>, transform_indices = @transform_2, window_bounds = array<i64: 1, 128>}, {pipeline_mode = #tpu.pipeline_mode<synchronous>, transform_indices = @transform_3, window_bounds = array<i64: 128, 128>}, {pipeline_mode = #tpu.pipeline_mode<synchronous>, transform_indices = @transform_4, window_bounds = array<i64: 3, 128>}, {transform_indices = @transform_5, window_bounds = array<i64: 8, 128>}]} {
    %c0 = arith.constant 0 : index
    %c0_0 = arith.constant 0 : index
    %0 = vector.load %arg1[%c0, %c0_0] : memref<8x32xf32, #tpu.memory_space<vmem>>, vector<8x32xf32>
    %c0_1 = arith.constant 0 : index
    %c0_2 = arith.constant 0 : index
    %1 = vector.load %arg2[%c0_1, %c0_2] : memref<32x128xf32, #tpu.memory_space<vmem>>, vector<32x128xf32>
    %c0_3 = arith.constant 0 : index
    %c0_4 = arith.constant 0 : index
    %2 = vector.load %arg4[%c0_3, %c0_4] : memref<128x128xf32, #tpu.memory_space<vmem>>, vector<128x128xf32>
    %cst = arith.constant dense<0.000000e+00> : vector<8x128xf32>
    %3 = tpu.matmul %0, %1, %cst {dimension_numbers = #tpu.dot_dimension_numbers<[1], [0], [0], [1], [0, 0, 1, 1], [], []>} : vector<8x32xf32>, vector<32x128xf32>, vector<8x128xf32> -> vector<8x128xf32>
    %c0_5 = arith.constant 0 : index
    %c0_6 = arith.constant 0 : index
    %4 = vector.load %arg3[%c0_5, %c0_6] : memref<1x128xf32, #tpu.memory_space<vmem>>, vector<1x128xf32>
    %5 = vector.broadcast %4 : vector<1x128xf32> to vector<8x128xf32>
    %6 = arith.addf %3, %5 : vector<8x128xf32>
    %cst_7 = arith.constant 5.000000e-01 : f32
    %7 = vector.broadcast %cst_7 : f32 to vector<8x128xf32>
    %8 = arith.mulf %7, %6 : vector<8x128xf32>
    %cst_8 = arith.constant 0.707106769 : f32
    %9 = vector.broadcast %cst_8 : f32 to vector<8x128xf32>
    %10 = arith.mulf %6, %9 : vector<8x128xf32>
    %11 = math.erf %10 : vector<8x128xf32>
    %cst_9 = arith.constant 1.000000e+00 : f32
    %12 = vector.broadcast %cst_9 : f32 to vector<8x128xf32>
    %13 = arith.addf %12, %11 : vector<8x128xf32>
    %14 = arith.mulf %8, %13 : vector<8x128xf32>
    %cst_10 = arith.constant dense<0.000000e+00> : vector<8x128xf32>
    %15 = tpu.matmul %14, %2, %cst_10 {dimension_numbers = #tpu.dot_dimension_numbers<[1], [0], [0], [1], [0, 0, 1, 1], [], []>} : vector<8x128xf32>, vector<128x128xf32>, vector<8x128xf32> -> vector<8x128xf32>
    %c0_11 = arith.constant 0 : index
    %c0_12 = arith.constant 0 : index
    %16 = vector.load %arg5[%c0_11, %c0_12] : memref<3x128xf32, #tpu.memory_space<vmem>>, vector<3x128xf32>
    %17 = vector.extract_strided_slice %16 {offsets = [0, 0], sizes = [1, 128], strides = [1, 1]} : vector<3x128xf32> to vector<1x128xf32>
    %18 = vector.broadcast %17 : vector<1x128xf32> to vector<8x128xf32>
    %19 = arith.addf %15, %18 : vector<8x128xf32>
    %cst_13 = arith.constant dense<0.000000e+00> : vector<8xf32>
    %20 = vector.multi_reduction <add>, %19, %cst_13 [1] : vector<8x128xf32> to vector<8xf32>
    %21 = vector.shape_cast %20 : vector<8xf32> to vector<8x1xf32>
    %cst_14 = arith.constant 3.125000e-02 : f32
    %22 = vector.broadcast %cst_14 : f32 to vector<8x1xf32>
    %23 = arith.mulf %21, %22 : vector<8x1xf32>
    %24 = tpu.iota {dimensions = array<i32: 1>} : vector<8x128xi32>
    %c32_i32 = arith.constant 32 : i32
    %25 = vector.broadcast %c32_i32 : i32 to vector<8x128xi32>
    %26 = arith.cmpi slt, %24, %25 : vector<8x128xi32>
    %27 = vector.broadcast %23 : vector<8x1xf32> to vector<8x128xf32>
    %28 = arith.subf %19, %27 : vector<8x128xf32>
    %cst_15 = arith.constant 0.000000e+00 : f32
    %29 = vector.broadcast %cst_15 : f32 to vector<8x128xf32>
    %30 = arith.select %26, %28, %29 : vector<8x128xi1>, vector<8x128xf32>
    %31 = arith.mulf %30, %30 : vector<8x128xf32>
    %cst_16 = arith.constant dense<0.000000e+00> : vector<8xf32>
    %32 = vector.multi_reduction <add>, %31, %cst_16 [1] : vector<8x128xf32> to vector<8xf32>
    %33 = vector.shape_cast %32 : vector<8xf32> to vector<8x1xf32>
    %cst_17 = arith.constant 3.125000e-02 : f32
    %34 = vector.broadcast %cst_17 : f32 to vector<8x1xf32>
    %35 = arith.mulf %33, %34 : vector<8x1xf32>
    %cst_18 = arith.constant 9.99999974E-6 : f32
    %36 = vector.broadcast %cst_18 : f32 to vector<8x1xf32>
    %37 = arith.addf %35, %36 : vector<8x1xf32>
    %38 = math.rsqrt %37 : vector<8x1xf32>
    %39 = vector.broadcast %38 : vector<8x1xf32> to vector<8x128xf32>
    %40 = arith.mulf %30, %39 : vector<8x128xf32>
    %41 = vector.extract_strided_slice %16 {offsets = [1, 0], sizes = [1, 128], strides = [1, 1]} : vector<3x128xf32> to vector<1x128xf32>
    %42 = vector.broadcast %41 : vector<1x128xf32> to vector<8x128xf32>
    %43 = arith.mulf %40, %42 : vector<8x128xf32>
    %44 = vector.extract_strided_slice %16 {offsets = [2, 0], sizes = [1, 128], strides = [1, 1]} : vector<3x128xf32> to vector<1x128xf32>
    %45 = vector.broadcast %44 : vector<1x128xf32> to vector<8x128xf32>
    %46 = arith.addf %43, %45 : vector<8x128xf32>
    %c0_19 = arith.constant 0 : index
    %c0_20 = arith.constant 0 : index
    %47 = vector.load %arg6[%c0_19, %c0_20] : memref<8x128xf32, #tpu.memory_space<vmem>>, vector<8x128xf32>
    tpu.vector_store %arg6[%c0_19, %c0_20], %46 {strides = array<i32>} : memref<8x128xf32, #tpu.memory_space<vmem>>, vector<8x128xf32>,
    return
  }
  func.func @transform_0(%arg0: i32) -> (i32, i32) {
    %c0_i32 = arith.constant 0 : i32
    %c0_i32_0 = arith.constant 0 : i32
    return %arg0, %c0_i32 : i32, i32
  }
  func.func @transform_1(%arg0: i32) -> (i32, i32) {
    %c0_i32 = arith.constant 0 : i32
    %c0_i32_0 = arith.constant 0 : i32
    %c0_i32_1 = arith.constant 0 : i32
    return %c0_i32, %c0_i32_0 : i32, i32
  }
  func.func @transform_2(%arg0: i32) -> (i32, i32) {
    %c0_i32 = arith.constant 0 : i32
    %c0_i32_0 = arith.constant 0 : i32
    %c0_i32_1 = arith.constant 0 : i32
    return %c0_i32, %c0_i32_0 : i32, i32
  }
  func.func @transform_3(%arg0: i32) -> (i32, i32) {
    %c0_i32 = arith.constant 0 : i32
    %c0_i32_0 = arith.constant 0 : i32
    %c0_i32_1 = arith.constant 0 : i32
    return %c0_i32, %c0_i32_0 : i32, i32
  }
  func.func @transform_4(%arg0: i32) -> (i32, i32) {
    %c0_i32 = arith.constant 0 : i32
    %c0_i32_0 = arith.constant 0 : i32
    %c0_i32_1 = arith.constant 0 : i32
    return %c0_i32, %c0_i32_0 : i32, i32
  }
  func.func @transform_5(%arg0: i32) -> (i32, i32) {
    %c0_i32 = arith.constant 0 : i32
    %c0_i32_0 = arith.constant 0 : i32
    return %arg0, %c0_i32 : i32, i32
  }
}

module attributes {stable_mosaic.version = 11 : i64} {
  func.func @_mlp_kernel(%arg0: i32, %arg1: memref<8x32xf32, #tpu.memory_space<vmem>>, %arg2: memref<32x128xf32, #tpu.memory_space<vmem>>, %arg3: memref<1x128xf32, #tpu.memory_space<vmem>>, %arg4: memref<128x128xf32, #tpu.memory_space<vmem>>, %arg5: memref<3x128xf32, #tpu.memory_space<vmem>>, %arg6: memref<8x128xf32, #tpu.memory_space<vmem>>) attributes {dimension_semantics = [#tpu.dimension_semantics<parallel>], iteration_bounds = array<i64: 2>, scalar_prefetch = 0 : i64, scratch_operands = 0 : i64, tpu.core_type = #tpu.core_type<tc>, window_params = [{transform_indices = @transform_0, window_bounds = array<i64: 8, 32>}, {pipeline_mode = #tpu.pipeline_mode<synchronous>, transform_indices = @transform_1, window_bounds = array<i64: 32, 128>}, {pipeline_mode = #tpu.pipeline_mode<synchronous>, transform_indices = @transform_2, window_bounds = array<i64: 1, 128>}, {pipeline_mode = #tpu.pipeline_mode<synchronous>, transform_indices = @transform_3, window_bounds = array<i64: 128, 128>}, {pipeline_mode = #tpu.pipeline_mode<synchronous>, transform_indices = @transform_4, window_bounds = array<i64: 3, 128>}, {transform_indices = @transform_5, window_bounds = array<i64: 8, 128>}]} {
    %c0 = arith.constant 0 : index
    %c0_0 = arith.constant 0 : index
    %0 = vector.load %arg1[%c0, %c0_0] : memref<8x32xf32, #tpu.memory_space<vmem>>, vector<8x32xf32>
    %c0_1 = arith.constant 0 : index
    %c0_2 = arith.constant 0 : index
    %1 = vector.load %arg2[%c0_1, %c0_2] : memref<32x128xf32, #tpu.memory_space<vmem>>, vector<32x128xf32>
    %c0_3 = arith.constant 0 : index
    %c0_4 = arith.constant 0 : index
    %2 = vector.load %arg4[%c0_3, %c0_4] : memref<128x128xf32, #tpu.memory_space<vmem>>, vector<128x128xf32>
    %cst = arith.constant dense<0.000000e+00> : vector<8x128xf32>
    %3 = tpu.matmul %0, %1, %cst {dimension_numbers = #tpu.dot_dimension_numbers<[1], [0], [0], [1], [0, 0, 1, 1], [], []>} : vector<8x32xf32>, vector<32x128xf32>, vector<8x128xf32> -> vector<8x128xf32>
    %c0_5 = arith.constant 0 : index
    %c0_6 = arith.constant 0 : index
    %4 = vector.load %arg3[%c0_5, %c0_6] : memref<1x128xf32, #tpu.memory_space<vmem>>, vector<1x128xf32>
    %5 = vector.broadcast %4 : vector<1x128xf32> to vector<8x128xf32>
    %6 = arith.addf %3, %5 : vector<8x128xf32>
    %cst_7 = arith.constant 5.000000e-01 : f32
    %7 = vector.broadcast %cst_7 : f32 to vector<8x128xf32>
    %8 = arith.mulf %7, %6 : vector<8x128xf32>
    %cst_8 = arith.constant 0.707106769 : f32
    %9 = vector.broadcast %cst_8 : f32 to vector<8x128xf32>
    %10 = arith.mulf %6, %9 : vector<8x128xf32>
    %11 = math.erf %10 : vector<8x128xf32>
    %cst_9 = arith.constant 1.000000e+00 : f32
    %12 = vector.broadcast %cst_9 : f32 to vector<8x128xf32>
    %13 = arith.addf %12, %11 : vector<8x128xf32>
    %14 = arith.mulf %8, %13 : vector<8x128xf32>
    %cst_10 = arith.constant dense<0.000000e+00> : vector<8x128xf32>
    %15 = tpu.matmul %14, %2, %cst_10 {dimension_numbers = #tpu.dot_dimension_numbers<[1], [0], [0], [1], [0, 0, 1, 1], [], []>} : vector<8x128xf32>, vector<128x128xf32>, vector<8x128xf32> -> vector<8x128xf32>
    %c0_11 = arith.constant 0 : index
    %c0_12 = arith.constant 0 : index
    %16 = vector.load %arg5[%c0_11, %c0_12] : memref<3x128xf32, #tpu.memory_space<vmem>>, vector<3x128xf32>
    %17 = vector.extract_strided_slice %16 {offsets = [0, 0], sizes = [1, 128], strides = [1, 1]} : vector<3x128xf32> to vector<1x128xf32>
    %18 = vector.broadcast %17 : vector<1x128xf32> to vector<8x128xf32>
    %19 = arith.addf %15, %18 : vector<8x128xf32>
    %cst_13 = arith.constant dense<0.000000e+00> : vector<8xf32>
    %20 = vector.multi_reduction <add>, %19, %cst_13 [1] : vector<8x128xf32> to vector<8xf32>
    %21 = vector.shape_cast %20 : vector<8xf32> to vector<8x1xf32>
    %cst_14 = arith.constant 3.125000e-02 : f32
    %22 = vector.broadcast %cst_14 : f32 to vector<8x1xf32>
    %23 = arith.mulf %21, %22 : vector<8x1xf32>
    %24 = tpu.iota {dimensions = array<i32: 1>} : vector<8x128xi32>
    %c32_i32 = arith.constant 32 : i32
    %25 = vector.broadcast %c32_i32 : i32 to vector<8x128xi32>
    %26 = arith.cmpi slt, %24, %25 : vector<8x128xi32>
    %27 = vector.broadcast %23 : vector<8x1xf32> to vector<8x128xf32>
    %28 = arith.subf %19, %27 : vector<8x128xf32>
    %cst_15 = arith.constant 0.000000e+00 : f32
    %29 = vector.broadcast %cst_15 : f32 to vector<8x128xf32>
    %30 = arith.select %26, %28, %29 : vector<8x128xi1>, vector<8x128xf32>
    %31 = arith.mulf %30, %30 : vector<8x128xf32>
    %cst_16 = arith.constant dense<0.000000e+00> : vector<8xf32>
    %32 = vector.multi_reduction <add>, %31, %cst_16 [1] : vector<8x128xf32> to vector<8xf32>
    %33 = vector.shape_cast %32 : vector<8xf32> to vector<8x1xf32>
    %cst_17 = arith.constant 3.125000e-02 : f32
    %34 = vector.broadcast %cst_17 : f32 to vector<8x1xf32>
    %35 = arith.mulf %33, %34 : vector<8x1xf32>
    %cst_18 = arith.constant 9.99999974E-6 : f32
    %36 = vector.broadcast %cst_18 : f32 to vector<8x1xf32>
    %37 = arith.addf %35, %36 : vector<8x1xf32>
    %38 = math.rsqrt %37 : vector<8x1xf32>
    %39 = vector.broadcast %38 : vector<8x1xf32> to vector<8x128xf32>
    %40 = arith.mulf %30, %39 : vector<8x128xf32>
    %41 = vector.extract_strided_slice %16 {offsets = [1, 0], sizes = [1, 128], strides = [1, 1]} : vector<3x128xf32> to vector<1x128xf32>
    %42 = vector.broadcast %41 : vector<1x128xf32> to vector<8x128xf32>
    %43 = arith.mulf %40, %42 : vector<8x128xf32>
    %44 = vector.extract_strided_slice %16 {offsets = [2, 0], sizes = [1, 128], strides = [1, 1]} : vector<3x128xf32> to vector<1x128xf32>
    %45 = vector.broadcast %44 : vector<1x128xf32> to vector<8x128xf32>
    %46 = arith.addf %43, %45 : vector<8x128xf32>
    %c0_19 = arith.constant 0 : index
    %c0_20 = arith.constant 0 : index
    %47 = vector.load %arg6[%c0_19, %c0_20] : memref<8x128xf32, #tpu.memory_space<vmem>>, vector<8x128xf32>
    tpu.vector_store %arg6[%c0_19, %c0_20], %46 {strides = array<i32>} : memref<8x128xf32, #tpu.memory_space<vmem>>, vector<8x128xf32>,
    return
  }
  func.func @transform_0(%arg0: i32) -> (i32, i32) {
    %c0_i32 = arith.constant 0 : i32
    %c0_i32_0 = arith.constant 0 : i32
    return %arg0, %c0_i32 : i32, i32
  }
  func.func @transform_1(%arg0: i32) -> (i32, i32) {
    %c0_i32 = arith.constant 0 : i32
    %c0_i32_0 = arith.constant 0 : i32
    %c0_i32_1 = arith.constant 0 : i32
    return %c0_i32, %c0_i32_0 : i32, i32
  }
  func.func @transform_2(%arg0: i32) -> (i32, i32) {
    %c0_i32 = arith.constant 0 : i32
    %c0_i32_0 = arith.constant 0 : i32
    %c0_i32_1 = arith.constant 0 : i32
    return %c0_i32, %c0_i32_0 : i32, i32
  }
  func.func @transform_3(%arg0: i32) -> (i32, i32) {
    %c0_i32 = arith.constant 0 : i32
    %c0_i32_0 = arith.constant 0 : i32
    %c0_i32_1 = arith.constant 0 : i32
    return %c0_i32, %c0_i32_0 : i32, i32
  }
  func.func @transform_4(%arg0: i32) -> (i32, i32) {
    %c0_i32 = arith.constant 0 : i32
    %c0_i32_0 = arith.constant 0 : i32
    %c0_i32_1 = arith.constant 0 : i32
    return %c0_i32, %c0_i32_0 : i32, i32
  }
  func.func @transform_5(%arg0: i32) -> (i32, i32) {
    %c0_i32 = arith.constant 0 : i32
    %c0_i32_0 = arith.constant 0 : i32
    return %arg0, %c0_i32 : i32, i32
  }
}

</mosaic_0001>

<bundles_post_ra>
// kernel: tpu_custom_call.1
= control target key start
LH: loop header
LB: loop body
LE: loop exit
PB: predicated region body
PF: predicated region fallthrough
CT: control target
= control target key end

     0   :  { %10 = vsyncpa [#allocation3], 0  ;;  %s1211_s0 = inlined_call_operand.hbm [shape: f32[16,32], index: 0, kind: input, shape index: {}]   ;;  %s1212_s1 = inlined_call_operand.hbm [shape: f32[32,128], index: 1, kind: input, shape index: {}]   ;;  %s1213_s2 = inlined_call_operand.vmem [shape: f32[1,128], index: 2, kind: input, shape index: {}]   ;;  %s1214_s3 = inlined_call_operand.hbm [shape: f32[128,128], index: 3, kind: input, shape index: {}]   ;;  %s1215_s4 = inlined_call_operand.vmem [shape: f32[3,128], index: 4, kind: input, shape index: {}]   ;;  %s1216_s5 = inlined_call_operand.hbm [shape: f32[16,128], index: 5, kind: output, shape index: {}]  }
   0x1   :  { %12 = vsyncpa [#allocation3 + $0x1], 0 }
   0x2   :  { %13 = vsyncpa [#allocation6], 0 }
   0x3   :  { %14 = vsyncpa [#allocation4], 0 }
   0x4   :  { %16 = vsyncpa [#allocation4 + $0x1], 0  ;;  %s969_s18 = smov 0   ;;  %s971_s19 = smov 0  }
   0x5   :  { %s973_s20 = smov 0   ;;  %s975_s21 = smov 0  }
   0x6 LB: > { %s990_s22 = sadd.s32 4294967295, %s928_s21   ;;  %s580_s23 = sadd.s32 4294967294, %s928_s21   ;;  %s928_s21 = sphi %s975_s21, %s1236_s21   ;;  %s924_s20 = sphi %s973_s20, %s1235_s20   ;;  %s920_s19 = sphi %s971_s19, %s1234_s19   ;;  %s916_s18 = sphi %s969_s18, %s1233_s18  }
   0x7   : > { %p42_p0 = scmp.ne.s32.totalorder %s920_s19, %s916_s18  ;;  %p1217_p1 = scmp.eq.s32.totalorder %s990_s22, 0 }
   0x8   : > { %p156_p3 = scmp.eq.s32.totalorder %s580_s23, 1  ;;  %p581_p5 = scmp.ge.s32.totalorder %s928_s21, 1 }
   0x9   : > { %p999_p4 = por %p1217_p1, %p42_p0  ;;  %p163_p7 = scmp.lt.s32.totalorder %s928_s21, 3 }
   0xa   : > { %p1004_p6 = por %p156_p3, %p42_p0  ;;  %s930_s27 = smov [#allocation5]  }
   0xb   : > { %s1220_s24 = scalar_select %p999_p4, 1, 0 }
   0xc   : > { %s1221_s25 = scalar_select %p1004_p6, 1, 0 }
   0xd   : > { %p1009_p8 = pnand %p581_p5, %p163_p7  ;;  %s175_s28 = sshll.u32 %s930_s27, 4  ;;  %s1013_s28 = int_to_ptr.vmem [resolvable:$true] %s175_s28 }
   0xe   : > { %s931_s30 = smov [#allocation7]   ;;  %s772_s9 = scalar_lea.hbm %s1212_s1, 512 }
   0xf   : > { %p708_p9 = pneg %p1009_p8  ;;  %s191_s6 = sshll.u32 %s931_s30, 4  ;;  %s1024_s6 = int_to_ptr.vmem [resolvable:$true] %s191_s6 }
  0x10   : > { %p773_p12 = scmp.ne.s32.totalorder %s1212_s1, %s772_s9  ;;  %p779_p5 = scmp.lt.u32.totalorder %s772_s9, %s1212_s1 }
  0x11   : > { %p1020_p11 = pnand %p708_p9, %p1217_p1 }
  0x13   : > { %p774_p13 = pneg %p1020_p11 }
  0x15   : > { %p775_p0 = pnand %p774_p13, %p773_p12 }
  0x17   : > { %p776_p3 = pneg %p775_p0 }
  0x19   : > { %p781_p7 = pnand %p779_p5, %p776_p3 }
  0x1b   : > { %784 = shalt.err (!%p781_p7)
}
  0x1c   : > { %s785_s14 = scalar_lea.vmem %s1013_s28, 512  ;;  %p793_p2 = scmp.lt.s32.totalorder %s1013_s28, %s1013_s28 }
  0x1d   : > { %p786_p9 = scmp.ne.s32.totalorder %s1013_s28, %s785_s14  ;;  %p794_p12 = scmp.lt.s32.totalorder %s785_s14, %s785_s14 }
  0x1f   : > { %p788_p10 = pnand %p786_p9, %p774_p13  ;;  %p795_p0 = por %p794_p12, %p793_p2 }
  0x21   : > { %p789_p1 = pneg %p788_p10 }
  0x23   : > { %p796_p6 = pnand %p795_p0, %p789_p1 }
  0x25   : > { %799 = shalt.err (!%p796_p6)
}
  0x26   : > { %s932_s15 = smov 128   ;;  %s933_s16 = smov 8  }
  0x27   : > { %711 = dma.hbm_to_vmem [thread:$0]  (!%p1020_p11), %s1212_s1, 512, %s1013_s28, [#allocation6], %s932_s15, %s932_s15, %s933_s16  }
  0x28   : > { %s800_s7 = scalar_lea.hbm %s1214_s3, 2048 }
  0x29   : > { %p801_p2 = scmp.ne.s32.totalorder %s1214_s3, %s800_s7  ;;  %p807_p10 = scmp.lt.u32.totalorder %s800_s7, %s1214_s3 }
  0x2b   : > { %p803_p1 = pnand %p801_p2, %p774_p13 }
  0x2d   : > { %p804_p6 = pneg %p803_p1 }
  0x2f   : > { %p809_p3 = pnand %p807_p10, %p804_p6 }
  0x31   : > { %812 = shalt.err (!%p809_p3)
}
  0x32   : > { %s813_s28 = scalar_lea.vmem %s1024_s6, 2048  ;;  %p821_p12 = scmp.lt.s32.totalorder %s1024_s6, %s1024_s6 }
  0x33   : > { %p814_p5 = scmp.ne.s32.totalorder %s1024_s6, %s813_s28  ;;  %p822_p0 = scmp.lt.s32.totalorder %s813_s28, %s813_s28 }
  0x35   : > { %p816_p7 = pnand %p814_p5, %p774_p13  ;;  %p823_p2 = por %p822_p0, %p821_p12 }
  0x37   : > { %p817_p9 = pneg %p816_p7 }
  0x39   : > { %p824_p1 = pnand %p823_p2, %p817_p9 }
  0x3b   : > { %827 = shalt.err (!%p824_p1)
}
  0x3c   : > { %714 = dma.hbm_to_vmem [thread:$0]  (!%p1020_p11), %s1214_s3, 2048, %s1024_s6, [#allocation6], %s932_s15, %s932_s15, %s933_s16  }
  0x3d   : > { %s1079_s14 = sadd.s32 1, %s928_s21   ;;  %s29_s29 = sadd.s32 1, %s924_s20 }
  0x3e   : > { %s26_s17 = ssub.s32 %s928_s21, %s1079_s14  ;;  %p36_p13 = scmp.ne.s32.totalorder %s924_s20, %s920_s19 }
  0x3f   : > { %p27_p6 = scmp.eq.s32.totalorder %s26_s17, 0  ;;  %p37_p10 = scmp.eq.s32.totalorder %s928_s21, 0 }
  0x40   : > { %p1224_p3 = scmp.eq.s32.totalorder %s990_s22, 1  ;;  %p725_p7 = scmp.lt.s32.totalorder %s928_s21, 2 }
  0x41   : > { %s1095_s27 = scalar_select %p27_p6, %s924_s20, %s29_s29  }
  0x42   : > { %p1089_p5 = por %p1224_p3, %p36_p13  ;;  %p38_p9 = por %p37_p10, %p36_p13 }
  0x43   : > { %s208_s30 = sand.u32 1, %s924_s20   ;;  %s586_s6 = sshll.u32 %s928_s21, 7 }
  0x44   : > { %s1225_s23 = scalar_select %p1089_p5, 1, 0 }
  0x45   : > { %s585_s7 = sshll.u32 %s208_s30, 3  ;;  %s1102_s8 = scalar_lea.hbm %s1211_s0, %s586_s6 }
  0x46   : > { %s212_s9 = scalar_lea.vmem [#allocation2], %s585_s7  ;;  %p1106_p11 = pnand %p725_p7, %p38_p9 }
  0x47   : > { %s219_s10 = sshll.u32 %s212_s9, 4  ;;  %s209_s28 = scalar_lea.sflag [#allocation3], %s208_s30  ;;  %s1104_s10 = int_to_ptr.vmem [resolvable:$true] %s219_s10 }
  0x48   : > { %s828_s12 = scalar_lea.hbm %s1102_s8, 128  ;;  %p830_p0 = pneg %p1106_p11 }
  0x49   : > { %p829_p12 = scmp.ne.s32.totalorder %s1102_s8, %s828_s12  ;;  %s833_s17 = scalar_lea.hbm %s1211_s0, 256 }
  0x4a   : > { %p834_p13 = scmp.lt.u32.totalorder %s1102_s8, %s1211_s0  ;;  %p835_p6 = scmp.lt.u32.totalorder %s833_s17, %s828_s12 }
  0x4b   : > { %p831_p2 = pnand %p830_p0, %p829_p12  ;;  %p837_p3 = scmp.lt.u32.totalorder %s828_s12, %s1102_s8 }
  0x4c   : > { %p836_p10 = por %p835_p6, %p834_p13 }
  0x4d   : > { %p832_p1 = pneg %p831_p2 }
  0x4e   : > { %p838_p7 = por %p837_p3, %p836_p10 }
  0x50   : > { %p839_p9 = pnand %p838_p7, %p832_p1 }
  0x52   : > { %842 = shalt.err (!%p839_p9)
}
  0x53   : > { %s843_s30 = scalar_lea.vmem %s1104_s10, 128  ;;  %s934_s15 = smov [#allocation2]  }
  0x54   : > { %p844_p12 = scmp.ne.s32.totalorder %s1104_s10, %s843_s30  ;;  %s848_s16 = sshll.u32 %s934_s15, 4  ;;  %s849_s16 = int_to_ptr.vmem [resolvable:$false] %s848_s16 }
  0x55   : > { %s850_s9 = scalar_lea.vmem %s849_s16, 256  ;;  %p851_p4 = scmp.lt.s32.totalorder %s1104_s10, %s849_s16 }
  0x56   : > { %p846_p2 = pnand %p844_p12, %p830_p0  ;;  %p852_p13 = scmp.lt.s32.totalorder %s850_s9, %s843_s30 }
  0x58   : > { %p847_p5 = pneg %p846_p2  ;;  %p853_p6 = por %p852_p13, %p851_p4 }
  0x5a   : > { %p854_p10 = pnand %p853_p6, %p847_p5 }
  0x5c   : > { %857 = shalt.err (!%p854_p10)
}
  0x5d   : > { %718 = dma.hbm_to_vmem [thread:$0]  (!%p1106_p11), %s1102_s8, 128, %s1104_s10, %s209_s28  }
  0x5e   : > { %228 = sbr.rel (%p1009_p8) target bundleno = 886 (0x376), region = 40  ;;  %s1138_s12 = sand.u32 (!%p1009_p8), 1, %s920_s19  }
  0x5f   : > { %s588_s13 = sshll.u32 (!%p1009_p8), %s1138_s12, 3  ;;  %s231_s29 = scalar_lea.sflag (!%p1009_p8), [#allocation3], %s1138_s12 }
  0x60   : > { %s1144_s17 = scalar_lea.vmem (!%p1009_p8), [#allocation2], %s588_s13  ;;  %p1227_p4 = scmp.ne.s32.totalorder (!%p1009_p8), %s1220_s24, 0 }
  0x65   : > { %903 = dma.done.wait (%p1227_p4), %s231_s29, 128  }
  0x66   : > { %905 = vsyncadd (%p1227_p4), %s231_s29, 4294967168  ;;  %p1228_p5 = scmp.eq.s32.totalorder %s990_s22, 0 }
  0x68   : > { %907 = dma.done.wait (%p1228_p5), [#allocation6], 2560   ;;  %p1229_p8 = pmov %p1228_p5 }
  0x69   : > { %v935_v0 = vmov 0.0|0.0   ;;  %vm936_vm0 = vmmov 0   ;;  %v937_v1 = vmov 0.0   ;;  %v270_v2 = vld [vmem:[#allocation5] sm:$0xff]  ;;  %v271_v3 = vld [vmem:[#allocation5 + $0x8] sm:$0xff]  ;;  %v272_v4 = vld [vmem:[#allocation5 + $0x10] sm:$0xff]  ;;  %v377_v42 = vlaneseq }
  0x6a   : > { %909 = vsyncadd (%p1229_p8), [#allocation6], 4294964736  ;;  %666 = vmatprep.subr.bf16.mxu0 %v935_v0  ;;  %628 = vmatprep.mubr.msk.f32.mxu0 %vm936_vm0, %v937_v1  ;;  %v667_v5 = vpack.c.bf16 %v271_v3, %v270_v2  ;;  %v273_v6 = vld [vmem:[#allocation5 + $0x18] sm:$0xff]  ;;  %v274_v7 = vld [vmem:[#allocation7] sm:$0xff]  ;;  %vm297_vm1 = vcmask 261120   ;;  %s595_s11 = sshll.u32 %s990_s22, 7 }
  0x6b   : > { %672 = vmatprep.subr.bf16.mxu1 %v935_v0  ;;  %663 = vmatprep.mubr.msk.f32.mxu1 %vm936_vm0, %v937_v1  ;;  %v275_v8 = vld [vmem:[#allocation7 + $0x8] sm:$0xff]  ;;  %v276_v9 = vld [vmem:[#allocation7 + $0x10] sm:$0xff]  ;;  %v277_v10 = vld [vmem:[#allocation7 + $0x18] sm:$0xff]  ;;  %v670_v11 = vpack.c.bf16 %v273_v6, %v272_v4  ;;  %v378_v43 = vshrl.u32 %v377_v42, 7  ;;  %v455_v50 = vand.u32 127, %v377_v42  ;;  %s268_s28 = scalar_lea.vmem [#allocation8], %s588_s13  ;;  %s1167_s15 = scalar_lea.hbm %s1216_s5, %s595_s11 }
  0x6c   : > { %668 = vmatpush3.bf16.msra.mxu0 %v667_v5  ;;  %v673_v12 = vpack.c.bf16 %v275_v8, %v274_v7  ;;  %v676_v13 = vpack.c.bf16 %v277_v10, %v276_v9  ;;  %v278_v14 = vld [vmem:[#allocation7 + $0x20] sm:$0xff]  ;;  %v279_v15 = vld [vmem:[#allocation7 + $0x28] sm:$0xff]  ;;  %v269_v16 = vld [vmem:[%s1144_s17] sm:$0xff]  ;;  %s491_s7 = sshll.u32 %s268_s28, 4  ;;  %s478_s16 = scalar_lea.sflag [#allocation4], %s1138_s12  ;;  %s1169_s7 = int_to_ptr.vmem [resolvable:$true] %s491_s7 }
  0x6d   : > { %669 = vmatprep.subr.bf16.mxu0 %v935_v0  ;;  %v679_v17 = vpack.c.bf16 %v279_v15, %v278_v14  ;;  %v280_v18 = vld [vmem:[#allocation7 + $0x30] sm:$0xff]  ;;  %v281_v19 = vld [vmem:[#allocation7 + $0x38] sm:$0xff]  ;;  %v282_v21 = vld [vmem:[#allocation7 + $0x40] sm:$0xff]  ;;  %v379_v44 = vsub.s32 0, %v378_v43  ;;  %vm456_vm2 = vcmp.lt.s32.totalorder %v455_v50, 32  ;;  %v468_v59 = vsub.s32 1, %v378_v43 }
  0x6e   : > { %674 = vmatpush3.bf16.msra.mxu1 %v673_v12  ;;  %v682_v20 = vpack.c.bf16 %v281_v19, %v280_v18  ;;  %v283_v22 = vld [vmem:[#allocation7 + $0x48] sm:$0xff]  ;;  %v284_v24 = vld [vmem:[#allocation7 + $0x50] sm:$0xff]  ;;  %v285_v25 = vld [vmem:[#allocation7 + $0x58] sm:$0xff]  ;;  %v473_v60 = vsub.s32 2, %v378_v43  ;;  %s858_s9 = scalar_lea.vmem %s1169_s7, 128  ;;  %p1230_p0 = scmp.ne.s32.totalorder %s1225_s23, 0 }
  0x6f   : > { %675 = vmatprep.subr.bf16.mxu1 %v935_v0  ;;  %v685_v23 = vpack.c.bf16 %v283_v22, %v282_v21  ;;  %v688_v26 = vpack.c.bf16 %v285_v25, %v284_v24  ;;  %v286_v27 = vld [vmem:[#allocation7 + $0x60] sm:$0xff]  ;;  %v287_v28 = vld [vmem:[#allocation7 + $0x68] sm:$0xff]  ;;  %v288_v30 = vld [vmem:[#allocation7 + $0x70] sm:$0xff]  ;;  %p859_p11 = scmp.ne.s32.totalorder %s1169_s7, %s858_s9  ;;  %s938_s22 = smov [#allocation8]  }
  0x70   : > { %671 = vmatpush3.bf16.msra.mxu0 %v670_v11  ;;  %v691_v29 = vpack.c.bf16 %v287_v28, %v286_v27  ;;  %v289_v31 = vld [vmem:[#allocation7 + $0x78] sm:$0xff]  ;;  %v592_v33 = vld [vmem:[%s1213_s2] ss:$0 sm:$0xff]  ;;  %s862_s13 = sshll.u32 %s938_s22, 4  ;;  %s863_s13 = int_to_ptr.vmem [resolvable:$false] %s862_s13 }
  0x71   : > { %v694_v32 = vpack.c.bf16 %v289_v31, %v288_v30  ;;  %v376_v45 = vld [vmem:[%s1215_s4] sm:$0x7]  ;;  %p860_p1 = pnand %p859_p11, %p1230_p0  ;;  %s864_s29 = scalar_lea.vmem %s863_s13, 256 }
  0x72   : > { %677 = vmatpush3.bf16.msra.mxu1 %v676_v13  ;;  %v380_v46 = vrot.slane %v376_v45, %v379_v44  ;;  %v469_v61 = vrot.slane %v376_v45, %v468_v59  ;;  %v474_v63 = vrot.slane %v376_v45, %v473_v60  ;;  %p865_p7 = scmp.lt.s32.totalorder %s1169_s7, %s863_s13  ;;  %p866_p9 = scmp.lt.s32.totalorder %s864_s29, %s858_s9 }
  0x73   : > { %629 = vmatmul.mubr.msk.f32.vlgmr.msra.gmra.mrb[0].mxu0 %vm297_vm1, %v269_v16  ;;  %678 = vmatprep.subr.bf16.mxu1 %v935_v0  ;;  %p861_p3 = pneg %p860_p1 }
  0x74   : > { %p867_p12 = por %p866_p9, %p865_p7 }
  0x76   : > { %680 = vmatpush3.bf16.msra.mxu1 %v679_v17  ;;  %p868_p2 = pnand %p867_p12, %p861_p3 }
  0x77   : > { %681 = vmatprep.subr.bf16.mxu1 %v935_v0 }
  0x7a   : > { %683 = vmatpush3.bf16.msra.mxu1 %v682_v20 }
  0x7b   : > { %684 = vmatprep.subr.bf16.mxu1 %v935_v0 }
  0x7e   : > { %686 = vmatpush3.bf16.msra.mxu1 %v685_v23 }
  0x7f   : > { %687 = vmatprep.subr.bf16.mxu1 %v935_v0 }
  0x82   : > { %689 = vmatpush3.bf16.msra.mxu1 %v688_v26 }
  0x83   : > { %690 = vmatprep.subr.bf16.mxu1 %v935_v0 }
  0x86   : > { %692 = vmatpush3.bf16.msra.mxu1 %v691_v29 }
  0x87   : > { %693 = vmatprep.subr.bf16.mxu1 %v935_v0 }
  0x8a   : > { %695 = vmatpush3.bf16.msra.mxu1 %v694_v32 }
 0x146   : > { %v367_v34 = vpop.f32.mrb[0].mxu0 }
 0x147   : > { %v368_v35 = vadd.f32 %v592_v33, %v367_v34  ;;  %v630_v36 = vpop.f32.mrb[1].mxu0 }
 0x149   : > { %v372_v37 = vmul.f32 0.70710677, %v368_v35  ;;  %v371_v39 = vmul.f32 0.5, %v368_v35 }
 0x14b   : > { %768 = verf.f32 %v372_v37 }
 0x155   : > { %v769_v38 = vpop.eup %768 }
 0x156   : > { %v374_v40 = vadd.f32 1.0, %v769_v38 }
 0x158   : > { %v375_v41 = vmul.f32 %v374_v40, %v371_v39 }
 0x15a   : > { %664 = vmatmul.mubr.f32.vlgmr.msra.gmra.mrb[0].mxu1 %v375_v41 }
 0x22d   : > { %v447_v47 = vpop.f32.mrb[0].mxu1 }
 0x22e   : > { %v448_v48 = vadd.f32 %v447_v47, %v380_v46  ;;  %v665_v49 = vpop.f32.mrb[1].mxu1 }
 0x230   : > { %451 = vadd.xlane.f32.xlu0 %v448_v48 }
 0x2bd   : > { %v452_v51 = vpop.xlane.xlu0 %451 }
 0x2be   : > { %v453_v52 = vmul.f32 0.03125, %v452_v51 }
 0x2c0   : > { %v457_v53 = vsub.f32 %v448_v48, %v453_v52 }
 0x2c2   : > { %v458_v54 = vsel %vm456_vm2, %v457_v53, 0.0 }
 0x2c3   : > { %v459_v55 = vmul.f32 %v458_v54, %v458_v54 }
 0x2c5   : > { %460 = vadd.xlane.f32.xlu0 %v459_v55 }
 0x352   : > { %v461_v56 = vpop.xlane.xlu0 %460 }
 0x353   : > { %v462_v57 = vmul.f32 0.03125, %v461_v56 }
 0x355   : > { %v463_v58 = vadd.f32 1e-05, %v462_v57 }
 0x357   : > { %770 = vrsqrt.f32 %v463_v58 }
 0x361   : > { %v771_v62 = vpop.eup %770 }
 0x362   : > { %v465_v0 = vmul.f32 %v771_v62, %v458_v54 }
 0x364   : > { %v470_v1 = vmul.f32 %v469_v61, %v465_v0 }
 0x366   : > { %v475_v2 = vadd.f32 %v474_v63, %v470_v1 }
 0x368   : > { %476 = vst [vmem:[%s268_s28] sm:$0xff] %v475_v2 }
 0x369   : > { %871 = shalt.err (!%p868_p2)
}
 0x36a   : > { %s872_s12 = scalar_lea.hbm %s1167_s15, 128  ;;  %s876_s26 = scalar_lea.hbm %s1216_s5, 256 }
 0x36b   : > { %p873_p13 = scmp.ne.s32.totalorder %s1167_s15, %s872_s12  ;;  %p877_p4 = scmp.lt.u32.totalorder %s1167_s15, %s1216_s5 }
 0x36c   : > { %p878_p5 = scmp.lt.u32.totalorder %s876_s26, %s872_s12  ;;  %p880_p11 = scmp.lt.u32.totalorder %s872_s12, %s1167_s15 }
 0x36d   : > { %p874_p6 = pnand %p873_p13, %p1230_p0 }
 0x36e   : > { %p879_p8 = por %p878_p5, %p877_p4 }
 0x36f   : > { %p875_p10 = pneg %p874_p6 }
 0x370   : > { %p881_p1 = por %p880_p11, %p879_p8 }
 0x372   : > { %p882_p3 = pnand %p881_p1, %p875_p10 }
 0x374   : > { %885 = shalt.err (!%p882_p3)
}
 0x375   : > { %706 = dma.vmem_to_hbm [thread:$0]  (%p1230_p0), %s1169_s7, 128, %s1167_s15, %s478_s16  }
 0x376 PF: > { %s503_s11 = sand.u32 1, %s916_s18   ;;  %p1231_p7 = scmp.ne.s32.totalorder %s1221_s25, 0 }
 0x377   : > { %p1232_p9 = scmp.ge.s32.totalorder %s928_s21, 2  ;;  %s504_s28 = scalar_lea.sflag [#allocation4], %s503_s11 }
 0x379   : > { %p720_p12 = pnand %p1232_p9, %p1231_p7 }
 0x37b   : > { %911 = dma.done.wait (!%p720_p12), %s504_s28, 128  }
 0x37c   : > { %913 = vsyncadd (!%p720_p12), %s504_s28, 4294967168  ;;  %p19_p2 = scmp.ge.s32.totalorder %s1079_s14, 4   ;;  %s1233_s18 = smov %s920_s19 }
 0x37d   : > { %s1234_s19 = smov %s924_s20  ;;  %s1235_s20 = smov %s1095_s27 }
 0x37e   : > { %s1236_s21 = smov %s1079_s14  ;;  %21 = sbr.rel (!%p19_p2) target bundleno = 6 (0x6), region = 93 }
 0x385   :  { %509 = vsyncpa [#allocation3], 1 }
 0x386   :  { %511 = vsyncpa [#allocation3 + $0x1], 1 }
 0x387   :  { %512 = vsyncpa [#allocation6], 1 }
 0x388   :  { %513 = vsyncpa [#allocation4], 1 }
 0x389   :  { %515 = vsyncpa [#allocation4 + $0x1], 1 }

// kernel: tpu_custom_call.1
= control target key start
LH: loop header
LB: loop body
LE: loop exit
PB: predicated region body
PF: predicated region fallthrough
CT: control target
= control target key end

     0   :  { %10 = vsyncpa [#allocation3], 0  ;;  %s1211_s0 = inlined_call_operand.hbm [shape: f32[16,32], index: 0, kind: input, shape index: {}]   ;;  %s1212_s1 = inlined_call_operand.hbm [shape: f32[32,128], index: 1, kind: input, shape index: {}]   ;;  %s1213_s2 = inlined_call_operand.vmem [shape: f32[1,128], index: 2, kind: input, shape index: {}]   ;;  %s1214_s3 = inlined_call_operand.hbm [shape: f32[128,128], index: 3, kind: input, shape index: {}]   ;;  %s1215_s4 = inlined_call_operand.vmem [shape: f32[3,128], index: 4, kind: input, shape index: {}]   ;;  %s1216_s5 = inlined_call_operand.hbm [shape: f32[16,128], index: 5, kind: output, shape index: {}]  }
   0x1   :  { %12 = vsyncpa [#allocation3 + $0x1], 0 }
   0x2   :  { %13 = vsyncpa [#allocation6], 0 }
   0x3   :  { %14 = vsyncpa [#allocation4], 0 }
   0x4   :  { %16 = vsyncpa [#allocation4 + $0x1], 0  ;;  %s969_s18 = smov 0   ;;  %s971_s19 = smov 0  }
   0x5   :  { %s973_s20 = smov 0   ;;  %s975_s21 = smov 0  }
   0x6 LB: > { %s990_s22 = sadd.s32 4294967295, %s928_s21   ;;  %s580_s23 = sadd.s32 4294967294, %s928_s21   ;;  %s928_s21 = sphi %s975_s21, %s1236_s21   ;;  %s924_s20 = sphi %s973_s20, %s1235_s20   ;;  %s920_s19 = sphi %s971_s19, %s1234_s19   ;;  %s916_s18 = sphi %s969_s18, %s1233_s18  }
   0x7   : > { %p42_p0 = scmp.ne.s32.totalorder %s920_s19, %s916_s18  ;;  %p1217_p1 = scmp.eq.s32.totalorder %s990_s22, 0 }
   0x8   : > { %p156_p3 = scmp.eq.s32.totalorder %s580_s23, 1  ;;  %p581_p5 = scmp.ge.s32.totalorder %s928_s21, 1 }
   0x9   : > { %p999_p4 = por %p1217_p1, %p42_p0  ;;  %p163_p7 = scmp.lt.s32.totalorder %s928_s21, 3 }
   0xa   : > { %p1004_p6 = por %p156_p3, %p42_p0  ;;  %s930_s27 = smov [#allocation5]  }
   0xb   : > { %s1220_s24 = scalar_select %p999_p4, 1, 0 }
   0xc   : > { %s1221_s25 = scalar_select %p1004_p6, 1, 0 }
   0xd   : > { %p1009_p8 = pnand %p581_p5, %p163_p7  ;;  %s175_s28 = sshll.u32 %s930_s27, 4  ;;  %s1013_s28 = int_to_ptr.vmem [resolvable:$true] %s175_s28 }
   0xe   : > { %s931_s30 = smov [#allocation7]   ;;  %s772_s9 = scalar_lea.hbm %s1212_s1, 512 }
   0xf   : > { %p708_p9 = pneg %p1009_p8  ;;  %s191_s6 = sshll.u32 %s931_s30, 4  ;;  %s1024_s6 = int_to_ptr.vmem [resolvable:$true] %s191_s6 }
  0x10   : > { %p773_p12 = scmp.ne.s32.totalorder %s1212_s1, %s772_s9  ;;  %p779_p5 = scmp.lt.u32.totalorder %s772_s9, %s1212_s1 }
  0x11   : > { %p1020_p11 = pnand %p708_p9, %p1217_p1 }
  0x13   : > { %p774_p13 = pneg %p1020_p11 }
  0x15   : > { %p775_p0 = pnand %p774_p13, %p773_p12 }
  0x17   : > { %p776_p3 = pneg %p775_p0 }
  0x19   : > { %p781_p7 = pnand %p779_p5, %p776_p3 }
  0x1b   : > { %784 = shalt.err (!%p781_p7)
}
  0x1c   : > { %s785_s14 = scalar_lea.vmem %s1013_s28, 512  ;;  %p793_p2 = scmp.lt.s32.totalorder %s1013_s28, %s1013_s28 }
  0x1d   : > { %p786_p9 = scmp.ne.s32.totalorder %s1013_s28, %s785_s14  ;;  %p794_p12 = scmp.lt.s32.totalorder %s785_s14, %s785_s14 }
  0x1f   : > { %p788_p10 = pnand %p786_p9, %p774_p13  ;;  %p795_p0 = por %p794_p12, %p793_p2 }
  0x21   : > { %p789_p1 = pneg %p788_p10 }
  0x23   : > { %p796_p6 = pnand %p795_p0, %p789_p1 }
  0x25   : > { %799 = shalt.err (!%p796_p6)
}
  0x26   : > { %s932_s15 = smov 128   ;;  %s933_s16 = smov 8  }
  0x27   : > { %711 = dma.hbm_to_vmem [thread:$0]  (!%p1020_p11), %s1212_s1, 512, %s1013_s28, [#allocation6], %s932_s15, %s932_s15, %s933_s16  }
  0x28   : > { %s800_s7 = scalar_lea.hbm %s1214_s3, 2048 }
  0x29   : > { %p801_p2 = scmp.ne.s32.totalorder %s1214_s3, %s800_s7  ;;  %p807_p10 = scmp.lt.u32.totalorder %s800_s7, %s1214_s3 }
  0x2b   : > { %p803_p1 = pnand %p801_p2, %p774_p13 }
  0x2d   : > { %p804_p6 = pneg %p803_p1 }
  0x2f   : > { %p809_p3 = pnand %p807_p10, %p804_p6 }
  0x31   : > { %812 = shalt.err (!%p809_p3)
}
  0x32   : > { %s813_s28 = scalar_lea.vmem %s1024_s6, 2048  ;;  %p821_p12 = scmp.lt.s32.totalorder %s1024_s6, %s1024_s6 }
  0x33   : > { %p814_p5 = scmp.ne.s32.totalorder %s1024_s6, %s813_s28  ;;  %p822_p0 = scmp.lt.s32.totalorder %s813_s28, %s813_s28 }
  0x35   : > { %p816_p7 = pnand %p814_p5, %p774_p13  ;;  %p823_p2 = por %p822_p0, %p821_p12 }
  0x37   : > { %p817_p9 = pneg %p816_p7 }
  0x39   : > { %p824_p1 = pnand %p823_p2, %p817_p9 }
  0x3b   : > { %827 = shalt.err (!%p824_p1)
}
  0x3c   : > { %714 = dma.hbm_to_vmem [thread:$0]  (!%p1020_p11), %s1214_s3, 2048, %s1024_s6, [#allocation6], %s932_s15, %s932_s15, %s933_s16  }
  0x3d   : > { %s1079_s14 = sadd.s32 1, %s928_s21   ;;  %s29_s29 = sadd.s32 1, %s924_s20 }
  0x3e   : > { %s26_s17 = ssub.s32 %s928_s21, %s1079_s14  ;;  %p36_p13 = scmp.ne.s32.totalorder %s924_s20, %s920_s19 }
  0x3f   : > { %p27_p6 = scmp.eq.s32.totalorder %s26_s17, 0  ;;  %p37_p10 = scmp.eq.s32.totalorder %s928_s21, 0 }
  0x40   : > { %p1224_p3 = scmp.eq.s32.totalorder %s990_s22, 1  ;;  %p725_p7 = scmp.lt.s32.totalorder %s928_s21, 2 }
  0x41   : > { %s1095_s27 = scalar_select %p27_p6, %s924_s20, %s29_s29  }
  0x42   : > { %p1089_p5 = por %p1224_p3, %p36_p13  ;;  %p38_p9 = por %p37_p10, %p36_p13 }
  0x43   : > { %s208_s30 = sand.u32 1, %s924_s20   ;;  %s586_s6 = sshll.u32 %s928_s21, 7 }
  0x44   : > { %s1225_s23 = scalar_select %p1089_p5, 1, 0 }
  0x45   : > { %s585_s7 = sshll.u32 %s208_s30, 3  ;;  %s1102_s8 = scalar_lea.hbm %s1211_s0, %s586_s6 }
  0x46   : > { %s212_s9 = scalar_lea.vmem [#allocation2], %s585_s7  ;;  %p1106_p11 = pnand %p725_p7, %p38_p9 }
  0x47   : > { %s219_s10 = sshll.u32 %s212_s9, 4  ;;  %s209_s28 = scalar_lea.sflag [#allocation3], %s208_s30  ;;  %s1104_s10 = int_to_ptr.vmem [resolvable:$true] %s219_s10 }
  0x48   : > { %s828_s12 = scalar_lea.hbm %s1102_s8, 128  ;;  %p830_p0 = pneg %p1106_p11 }
  0x49   : > { %p829_p12 = scmp.ne.s32.totalorder %s1102_s8, %s828_s12  ;;  %s833_s17 = scalar_lea.hbm %s1211_s0, 256 }
  0x4a   : > { %p834_p13 = scmp.lt.u32.totalorder %s1102_s8, %s1211_s0  ;;  %p835_p6 = scmp.lt.u32.totalorder %s833_s17, %s828_s12 }
  0x4b   : > { %p831_p2 = pnand %p830_p0, %p829_p12  ;;  %p837_p3 = scmp.lt.u32.totalorder %s828_s12, %s1102_s8 }
  0x4c   : > { %p836_p10 = por %p835_p6, %p834_p13 }
  0x4d   : > { %p832_p1 = pneg %p831_p2 }
  0x4e   : > { %p838_p7 = por %p837_p3, %p836_p10 }
  0x50   : > { %p839_p9 = pnand %p838_p7, %p832_p1 }
  0x52   : > { %842 = shalt.err (!%p839_p9)
}
  0x53   : > { %s843_s30 = scalar_lea.vmem %s1104_s10, 128  ;;  %s934_s15 = smov [#allocation2]  }
  0x54   : > { %p844_p12 = scmp.ne.s32.totalorder %s1104_s10, %s843_s30  ;;  %s848_s16 = sshll.u32 %s934_s15, 4  ;;  %s849_s16 = int_to_ptr.vmem [resolvable:$false] %s848_s16 }
  0x55   : > { %s850_s9 = scalar_lea.vmem %s849_s16, 256  ;;  %p851_p4 = scmp.lt.s32.totalorder %s1104_s10, %s849_s16 }
  0x56   : > { %p846_p2 = pnand %p844_p12, %p830_p0  ;;  %p852_p13 = scmp.lt.s32.totalorder %s850_s9, %s843_s30 }
  0x58   : > { %p847_p5 = pneg %p846_p2  ;;  %p853_p6 = por %p852_p13, %p851_p4 }
  0x5a   : > { %p854_p10 = pnand %p853_p6, %p847_p5 }
  0x5c   : > { %857 = shalt.err (!%p854_p10)
}
  0x5d   : > { %718 = dma.hbm_to_vmem [thread:$0]  (!%p1106_p11), %s1102_s8, 128, %s1104_s10, %s209_s28  }
  0x5e   : > { %228 = sbr.rel (%p1009_p8) target bundleno = 886 (0x376), region = 40  ;;  %s1138_s12 = sand.u32 (!%p1009_p8), 1, %s920_s19  }
  0x5f   : > { %s588_s13 = sshll.u32 (!%p1009_p8), %s1138_s12, 3  ;;  %s231_s29 = scalar_lea.sflag (!%p1009_p8), [#allocation3], %s1138_s12 }
  0x60   : > { %s1144_s17 = scalar_lea.vmem (!%p1009_p8), [#allocation2], %s588_s13  ;;  %p1227_p4 = scmp.ne.s32.totalorder (!%p1009_p8), %s1220_s24, 0 }
  0x65   : > { %903 = dma.done.wait (%p1227_p4), %s231_s29, 128  }
  0x66   : > { %905 = vsyncadd (%p1227_p4), %s231_s29, 4294967168  ;;  %p1228_p5 = scmp.eq.s32.totalorder %s990_s22, 0 }
  0x68   : > { %907 = dma.done.wait (%p1228_p5), [#allocation6], 2560   ;;  %p1229_p8 = pmov %p1228_p5 }
  0x69   : > { %v935_v0 = vmov 0.0|0.0   ;;  %vm936_vm0 = vmmov 0   ;;  %v937_v1 = vmov 0.0   ;;  %v270_v2 = vld [vmem:[#allocation5] sm:$0xff]  ;;  %v271_v3 = vld [vmem:[#allocation5 + $0x8] sm:$0xff]  ;;  %v272_v4 = vld [vmem:[#allocation5 + $0x10] sm:$0xff]  ;;  %v377_v42 = vlaneseq }
  0x6a   : > { %909 = vsyncadd (%p1229_p8), [#allocation6], 4294964736  ;;  %666 = vmatprep.subr.bf16.mxu0 %v935_v0  ;;  %628 = vmatprep.mubr.msk.f32.mxu0 %vm936_vm0, %v937_v1  ;;  %v667_v5 = vpack.c.bf16 %v271_v3, %v270_v2  ;;  %v273_v6 = vld [vmem:[#allocation5 + $0x18] sm:$0xff]  ;;  %v274_v7 = vld [vmem:[#allocation7] sm:$0xff]  ;;  %vm297_vm1 = vcmask 261120   ;;  %s595_s11 = sshll.u32 %s990_s22, 7 }
  0x6b   : > { %672 = vmatprep.subr.bf16.mxu1 %v935_v0  ;;  %663 = vmatprep.mubr.msk.f32.mxu1 %vm936_vm0, %v937_v1  ;;  %v275_v8 = vld [vmem:[#allocation7 + $0x8] sm:$0xff]  ;;  %v276_v9 = vld [vmem:[#allocation7 + $0x10] sm:$0xff]  ;;  %v277_v10 = vld [vmem:[#allocation7 + $0x18] sm:$0xff]  ;;  %v670_v11 = vpack.c.bf16 %v273_v6, %v272_v4  ;;  %v378_v43 = vshrl.u32 %v377_v42, 7  ;;  %v455_v50 = vand.u32 127, %v377_v42  ;;  %s268_s28 = scalar_lea.vmem [#allocation8], %s588_s13  ;;  %s1167_s15 = scalar_lea.hbm %s1216_s5, %s595_s11 }
  0x6c   : > { %668 = vmatpush3.bf16.msra.mxu0 %v667_v5  ;;  %v673_v12 = vpack.c.bf16 %v275_v8, %v274_v7  ;;  %v676_v13 = vpack.c.bf16 %v277_v10, %v276_v9  ;;  %v278_v14 = vld [vmem:[#allocation7 + $0x20] sm:$0xff]  ;;  %v279_v15 = vld [vmem:[#allocation7 + $0x28] sm:$0xff]  ;;  %v269_v16 = vld [vmem:[%s1144_s17] sm:$0xff]  ;;  %s491_s7 = sshll.u32 %s268_s28, 4  ;;  %s478_s16 = scalar_lea.sflag [#allocation4], %s1138_s12  ;;  %s1169_s7 = int_to_ptr.vmem [resolvable:$true] %s491_s7 }
  0x6d   : > { %669 = vmatprep.subr.bf16.mxu0 %v935_v0  ;;  %v679_v17 = vpack.c.bf16 %v279_v15, %v278_v14  ;;  %v280_v18 = vld [vmem:[#allocation7 + $0x30] sm:$0xff]  ;;  %v281_v19 = vld [vmem:[#allocation7 + $0x38] sm:$0xff]  ;;  %v282_v21 = vld [vmem:[#allocation7 + $0x40] sm:$0xff]  ;;  %v379_v44 = vsub.s32 0, %v378_v43  ;;  %vm456_vm2 = vcmp.lt.s32.totalorder %v455_v50, 32  ;;  %v468_v59 = vsub.s32 1, %v378_v43 }
  0x6e   : > { %674 = vmatpush3.bf16.msra.mxu1 %v673_v12  ;;  %v682_v20 = vpack.c.bf16 %v281_v19, %v280_v18  ;;  %v283_v22 = vld [vmem:[#allocation7 + $0x48] sm:$0xff]  ;;  %v284_v24 = vld [vmem:[#allocation7 + $0x50] sm:$0xff]  ;;  %v285_v25 = vld [vmem:[#allocation7 + $0x58] sm:$0xff]  ;;  %v473_v60 = vsub.s32 2, %v378_v43  ;;  %s858_s9 = scalar_lea.vmem %s1169_s7, 128  ;;  %p1230_p0 = scmp.ne.s32.totalorder %s1225_s23, 0 }
  0x6f   : > { %675 = vmatprep.subr.bf16.mxu1 %v935_v0  ;;  %v685_v23 = vpack.c.bf16 %v283_v22, %v282_v21  ;;  %v688_v26 = vpack.c.bf16 %v285_v25, %v284_v24  ;;  %v286_v27 = vld [vmem:[#allocation7 + $0x60] sm:$0xff]  ;;  %v287_v28 = vld [vmem:[#allocation7 + $0x68] sm:$0xff]  ;;  %v288_v30 = vld [vmem:[#allocation7 + $0x70] sm:$0xff]  ;;  %p859_p11 = scmp.ne.s32.totalorder %s1169_s7, %s858_s9  ;;  %s938_s22 = smov [#allocation8]  }
  0x70   : > { %671 = vmatpush3.bf16.msra.mxu0 %v670_v11  ;;  %v691_v29 = vpack.c.bf16 %v287_v28, %v286_v27  ;;  %v289_v31 = vld [vmem:[#allocation7 + $0x78] sm:$0xff]  ;;  %v592_v33 = vld [vmem:[%s1213_s2] ss:$0 sm:$0xff]  ;;  %s862_s13 = sshll.u32 %s938_s22, 4  ;;  %s863_s13 = int_to_ptr.vmem [resolvable:$false] %s862_s13 }
  0x71   : > { %v694_v32 = vpack.c.bf16 %v289_v31, %v288_v30  ;;  %v376_v45 = vld [vmem:[%s1215_s4] sm:$0x7]  ;;  %p860_p1 = pnand %p859_p11, %p1230_p0  ;;  %s864_s29 = scalar_lea.vmem %s863_s13, 256 }
  0x72   : > { %677 = vmatpush3.bf16.msra.mxu1 %v676_v13  ;;  %v380_v46 = vrot.slane %v376_v45, %v379_v44  ;;  %v469_v61 = vrot.slane %v376_v45, %v468_v59  ;;  %v474_v63 = vrot.slane %v376_v45, %v473_v60  ;;  %p865_p7 = scmp.lt.s32.totalorder %s1169_s7, %s863_s13  ;;  %p866_p9 = scmp.lt.s32.totalorder %s864_s29, %s858_s9 }
  0x73   : > { %629 = vmatmul.mubr.msk.f32.vlgmr.msra.gmra.mrb[0].mxu0 %vm297_vm1, %v269_v16  ;;  %678 = vmatprep.subr.bf16.mxu1 %v935_v0  ;;  %p861_p3 = pneg %p860_p1 }
  0x74   : > { %p867_p12 = por %p866_p9, %p865_p7 }
  0x76   : > { %680 = vmatpush3.bf16.msra.mxu1 %v679_v17  ;;  %p868_p2 = pnand %p867_p12, %p861_p3 }
  0x77   : > { %681 = vmatprep.subr.bf16.mxu1 %v935_v0 }
  0x7a   : > { %683 = vmatpush3.bf16.msra.mxu1 %v682_v20 }
  0x7b   : > { %684 = vmatprep.subr.bf16.mxu1 %v935_v0 }
  0x7e   : > { %686 = vmatpush3.bf16.msra.mxu1 %v685_v23 }
  0x7f   : > { %687 = vmatprep.subr.bf16.mxu1 %v935_v0 }
  0x82   : > { %689 = vmatpush3.bf16.msra.mxu1 %v688_v26 }
  0x83   : > { %690 = vmatprep.subr.bf16.mxu1 %v935_v0 }
  0x86   : > { %692 = vmatpush3.bf16.msra.mxu1 %v691_v29 }
  0x87   : > { %693 = vmatprep.subr.bf16.mxu1 %v935_v0 }
  0x8a   : > { %695 = vmatpush3.bf16.msra.mxu1 %v694_v32 }
 0x146   : > { %v367_v34 = vpop.f32.mrb[0].mxu0 }
 0x147   : > { %v368_v35 = vadd.f32 %v592_v33, %v367_v34  ;;  %v630_v36 = vpop.f32.mrb[1].mxu0 }
 0x149   : > { %v372_v37 = vmul.f32 0.70710677, %v368_v35  ;;  %v371_v39 = vmul.f32 0.5, %v368_v35 }
 0x14b   : > { %768 = verf.f32 %v372_v37 }
 0x155   : > { %v769_v38 = vpop.eup %768 }
 0x156   : > { %v374_v40 = vadd.f32 1.0, %v769_v38 }
 0x158   : > { %v375_v41 = vmul.f32 %v374_v40, %v371_v39 }
 0x15a   : > { %664 = vmatmul.mubr.f32.vlgmr.msra.gmra.mrb[0].mxu1 %v375_v41 }
 0x22d   : > { %v447_v47 = vpop.f32.mrb[0].mxu1 }
 0x22e   : > { %v448_v48 = vadd.f32 %v447_v47, %v380_v46  ;;  %v665_v49 = vpop.f32.mrb[1].mxu1 }
 0x230   : > { %451 = vadd.xlane.f32.xlu0 %v448_v48 }
 0x2bd   : > { %v452_v51 = vpop.xlane.xlu0 %451 }
 0x2be   : > { %v453_v52 = vmul.f32 0.03125, %v452_v51 }
 0x2c0   : > { %v457_v53 = vsub.f32 %v448_v48, %v453_v52 }
 0x2c2   : > { %v458_v54 = vsel %vm456_vm2, %v457_v53, 0.0 }
 0x2c3   : > { %v459_v55 = vmul.f32 %v458_v54, %v458_v54 }
 0x2c5   : > { %460 = vadd.xlane.f32.xlu0 %v459_v55 }
 0x352   : > { %v461_v56 = vpop.xlane.xlu0 %460 }
 0x353   : > { %v462_v57 = vmul.f32 0.03125, %v461_v56 }
 0x355   : > { %v463_v58 = vadd.f32 1e-05, %v462_v57 }
 0x357   : > { %770 = vrsqrt.f32 %v463_v58 }
 0x361   : > { %v771_v62 = vpop.eup %770 }
 0x362   : > { %v465_v0 = vmul.f32 %v771_v62, %v458_v54 }
 0x364   : > { %v470_v1 = vmul.f32 %v469_v61, %v465_v0 }
 0x366   : > { %v475_v2 = vadd.f32 %v474_v63, %v470_v1 }
 0x368   : > { %476 = vst [vmem:[%s268_s28] sm:$0xff] %v475_v2 }
 0x369   : > { %871 = shalt.err (!%p868_p2)
}
 0x36a   : > { %s872_s12 = scalar_lea.hbm %s1167_s15, 128  ;;  %s876_s26 = scalar_lea.hbm %s1216_s5, 256 }
 0x36b   : > { %p873_p13 = scmp.ne.s32.totalorder %s1167_s15, %s872_s12  ;;  %p877_p4 = scmp.lt.u32.totalorder %s1167_s15, %s1216_s5 }
 0x36c   : > { %p878_p5 = scmp.lt.u32.totalorder %s876_s26, %s872_s12  ;;  %p880_p11 = scmp.lt.u32.totalorder %s872_s12, %s1167_s15 }
 0x36d   : > { %p874_p6 = pnand %p873_p13, %p1230_p0 }
 0x36e   : > { %p879_p8 = por %p878_p5, %p877_p4 }
 0x36f   : > { %p875_p10 = pneg %p874_p6 }
 0x370   : > { %p881_p1 = por %p880_p11, %p879_p8 }
 0x372   : > { %p882_p3 = pnand %p881_p1, %p875_p10 }
 0x374   : > { %885 = shalt.err (!%p882_p3)
}
 0x375   : > { %706 = dma.vmem_to_hbm [thread:$0]  (%p1230_p0), %s1169_s7, 128, %s1167_s15, %s478_s16  }
 0x376 PF: > { %s503_s11 = sand.u32 1, %s916_s18   ;;  %p1231_p7 = scmp.ne.s32.totalorder %s1221_s25, 0 }
 0x377   : > { %p1232_p9 = scmp.ge.s32.totalorder %s928_s21, 2  ;;  %s504_s28 = scalar_lea.sflag [#allocation4], %s503_s11 }
 0x379   : > { %p720_p12 = pnand %p1232_p9, %p1231_p7 }
 0x37b   : > { %911 = dma.done.wait (!%p720_p12), %s504_s28, 128  }
 0x37c   : > { %913 = vsyncadd (!%p720_p12), %s504_s28, 4294967168  ;;  %p19_p2 = scmp.ge.s32.totalorder %s1079_s14, 4   ;;  %s1233_s18 = smov %s920_s19 }
 0x37d   : > { %s1234_s19 = smov %s924_s20  ;;  %s1235_s20 = smov %s1095_s27 }
 0x37e   : > { %s1236_s21 = smov %s1079_s14  ;;  %21 = sbr.rel (!%p19_p2) target bundleno = 6 (0x6), region = 93 }
 0x385   :  { %509 = vsyncpa [#allocation3], 1 }
 0x386   :  { %511 = vsyncpa [#allocation3 + $0x1], 1 }
 0x387   :  { %512 = vsyncpa [#allocation6], 1 }
 0x388   :  { %513 = vsyncpa [#allocation4], 1 }
 0x389   :  { %515 = vsyncpa [#allocation4 + $0x1], 1 }

</bundles_post_ra>
